<compile_context>
chip_gen: v6e
topology: v6e:2x2x1
jax: 0.10.0
libtpu: 0.0.40
codegen_flags: <defaults>
</compile_context>

<pallas_src>
import functools
import math

import numpy as np
import jax
import jax.numpy as jnp
from jax import lax
from jax.experimental import pallas as pl
from jax.experimental.pallas import tpu as pltpu


def _logalike_kernel(xs_ref, si_ref, lf_ref, wt_ref, x_ref, ch_ref, out_ref, acc_ref, *,
                     i, mu, inv_rho, sqrt_rho, inv_s, num_cells, num_states,
                     num_sites, n_terms, block_j, nblocks_inner, off_a, off_d):
    c = pl.program_id(0)          # TensorCore split (parallel)
    jb = pl.program_id(1)         # j-block within this split (arbitrary / carried acc)

    @pl.when(jb == 0)
    def _init():
        acc_ref[...] = jnp.zeros_like(acc_ref)

    # ---- Lorentz distances for the whole block; j is the lane axis ----------------
    # xs = X[i] with the time-like coordinate negated (zero-padded to 8 sublanes), so
    # <x_i, x_j>_L = sum_d xs[d] * x_j[d]  is a cheap 8-sublane reduce.
    xj = x_ref[...]                                                    # (8, TJ)
    inner = jnp.sum(xs_ref[...] * xj, axis=0, keepdims=True)           # (1, TJ)
    d = jnp.maximum(-inner * inv_rho - 1.0, 1e-7)                      # arccosh arg - 1
    dist = sqrt_rho * jnp.log1p(d + jnp.sqrt(d * (d + 2.0)))           # cancellation-safe
    mt = jnp.maximum((0.5 * mu) * dist, 1e-30)                         # (1, TJ), > 0

    # ---- Poisson weights of the uniformised expm series, closed form --------------
    # tw[k, j] = exp(k*log(mt_j) - mt_j - log k!)  (log-domain per term: no cascading
    # underflow for large mu*t, no serial recurrence, no column concat).
    k = lax.broadcasted_iota(jnp.int32, (n_terms, block_j), 0).astype(jnp.float32)
    tw = jnp.exp(k * jnp.log(mt) - mt - lf_ref[...])                   # (K, TJ)

    # ---- ONE fused MXU matmul for every series-weighted quantity ------------------
    res = jnp.dot(wt_ref[...], tw, preferred_element_type=jnp.float32)  # (WR, TJ)
    row0 = res[0:num_states, :]                       # P_j[0, s]        (S,  TJ)
    a_i = res[off_a:off_a + num_sites, :]             # P_j[0, s_i]      (ns, TJ)
    d_i = res[off_d:off_d + num_sites, :]             # P_j[s_i, s_i]    (ns, TJ)

    # ---- j-side gather: b_j[site, j] = P_j[0, chars[j, site]] ---------------------
    ch = ch_ref[...]                                                   # (ns, TJ) int32
    b_j = jnp.zeros(ch.shape, jnp.float32)
    for s in range(num_states):
        b_j = b_j + jnp.where(ch == s, row0[s:s + 1, :], 0.0)          # sublane-row view

    # ---- feasible ancestors: a = 0 always; additionally a = s_i when s_i == s_j != 0
    si = si_ref[...]                                                   # (ns, 1) int32
    eq_nz = jnp.logical_and(ch == si, si > 0)
    cur = inv_s * (a_i * b_j + jnp.where(eq_nz, d_i * d_i, 0.0))

    # ---- masked accumulation into the lane-dense VMEM scratch ---------------------
    # j == i and padding columns contribute log(1) = 0; valid probabilities are never
    # clamped (no unconditional floor).
    jcol = ((c * nblocks_inner + jb) * block_j
            + lax.broadcasted_iota(jnp.int32, (1, block_j), 1))
    valid = jnp.logical_and(jcol != i, jcol < num_cells)
    acc_ref[...] += jnp.log(jnp.where(valid, cur, 1.0))

    @pl.when(jb == pl.num_programs(1) - 1)
    def _finalize():
        out_ref[...] = jnp.sum(acc_ref[...], keepdims=True).reshape(1, 1, 1)


def logalike_pallas(X, chars, Q, i, rho, S, *, block_j=512, n_split=2):
    """Logalike forward.  X:(N, D+1) f32 hyperboloid points, chars:(N, ns) int,
    Q:(S, S) generator, concrete cell index i."""
    X = jnp.asarray(X, jnp.float32)
    chars = jnp.asarray(chars, jnp.int32)
    num_cells, damb = X.shape
    num_sites = chars.shape[1]
    rho = float(rho)
    S = int(S)
    i = int(i)
    sqrt_rho = math.sqrt(rho)

    # ----------------- host-side precompute (all Q- and i-dependent setup) ---------
    Xn = np.asarray(X, dtype=np.float64)
    Qn = np.asarray(Q, dtype=np.float64)
    si_np = np.asarray(chars)[i].astype(np.int64)                      # (ns,)

    mu = float(max(np.max(-np.diag(Qn)), 1e-30))
    M = np.eye(S) + Qn / mu                                            # stochastic matrix

    # i-INDEPENDENT bound on mu * dist/2 via the triangle inequality through the origin,
    # so n_terms (and hence the compiled kernel) is fixed per dataset, not per i.
    r_o = sqrt_rho * np.arccosh(np.maximum(Xn[:, 0] / sqrt_rho, 1.0))
    lam = mu * float(np.max(r_o))
    n_terms = int(np.ceil(lam + 8.0 * np.sqrt(lam + 1.0) + 10.0))
    n_terms = max(16, ((n_terms + 7) // 8) * 8)                        # MXU-friendly K

    # Fused, transposed series-weight matrix: one MXU matmul yields
    #   rows [0, S)            -> P_j[0, s]
    #   rows [off_a, off_a+ns) -> P_j[0, s_i[site]]   (i-side gather folded in)
    #   rows [off_d, off_d+ns) -> P_j[s_i, s_i]
    s_pad = ((S + 7) // 8) * 8
    ns_pad = ((num_sites + 7) // 8) * 8
    off_a, off_d = s_pad, s_pad + ns_pad
    w_rows = s_pad + 2 * ns_pad
    W = np.zeros((n_terms, w_rows), dtype=np.float64)
    Mk = np.eye(S)
    for k in range(n_terms):
        W[k, 0:S] = Mk[0, :]                       # (M^k)[0, :]
        W[k, off_a:off_a + num_sites] = Mk[0, si_np]
        W[k, off_d:off_d + num_sites] = Mk[si_np, si_np]
        Mk = Mk @ M
    Wt = jnp.asarray(W.T, jnp.float32)             # (w_rows, n_terms)

    logfact = jnp.asarray(
        np.array([math.lgamma(k + 1.0) for k in range(n_terms)],
                 dtype=np.float32)[:, None])       # (n_terms, 1)

    damb_pad = ((damb + 7) // 8) * 8
    sgn = np.ones((damb,), dtype=np.float64)
    sgn[0] = -1.0
    xs_np = np.zeros((damb_pad, 1), dtype=np.float32)
    xs_np[:damb, 0] = Xn[i] * sgn                  # Lorentz sign folded in; zero-padded rows
    xs = jnp.asarray(xs_np)
    si_col = jnp.asarray(si_np[:, None], jnp.int32)                    # (ns, 1)

    # ----------------- pad & tile the partner (j) axis as the LANE dimension -------
    tj = min(int(block_j), ((num_cells + 127) // 128) * 128)
    tj = max(128, ((tj + 127) // 128) * 128)
    total_blocks = -(-num_cells // tj)
    n_split = int(n_split) if total_blocks >= 2 else 1                 # v7x dual-TC split
    nblocks_inner = -(-total_blocks // n_split)
    padded = n_split * nblocks_inner * tj

    Xt = jnp.zeros((damb_pad, padded), jnp.float32)
    Xt = Xt.at[:damb, :num_cells].set(X.T)
    if padded > num_cells:                         # pad with a valid hyperboloid point
        Xt = Xt.at[:damb, num_cells:].set(
            jnp.broadcast_to(X[0][:, None], (damb, padded - num_cells)))
    Ct = jnp.zeros((num_sites, padded), jnp.int32)
    Ct = Ct.at[:, :num_cells].set(chars.T)

    kernel = functools.partial(
        _logalike_kernel,
        i=i, mu=mu, inv_rho=1.0 / rho, sqrt_rho=sqrt_rho, inv_s=1.0 / float(S),
        num_cells=num_cells, num_states=S, num_sites=num_sites, n_terms=n_terms,
        block_j=tj, nblocks_inner=nblocks_inner, off_a=off_a, off_d=off_d)

    out = pl.pallas_call(
        kernel,
        out_shape=jax.ShapeDtypeStruct((n_split, 1, 1), jnp.float32),
        grid_spec=pltpu.PrefetchScalarGridSpec(
            num_scalar_prefetch=0,
            grid=(n_split, nblocks_inner),
            in_specs=[
                pl.BlockSpec((damb_pad, 1), lambda c, jb: (0, 0)),           # xs
                pl.BlockSpec((num_sites, 1), lambda c, jb: (0, 0)),          # chars[i]
                pl.BlockSpec((n_terms, 1), lambda c, jb: (0, 0)),            # log k!
                pl.BlockSpec((w_rows, n_terms), lambda c, jb: (0, 0)),       # fused weights
                pl.BlockSpec((damb_pad, tj),
                             lambda c, jb: (0, c * nblocks_inner + jb)),     # X^T tile
                pl.BlockSpec((num_sites, tj),
                             lambda c, jb: (0, c * nblocks_inner + jb)),     # chars^T tile
            ],
            out_specs=pl.BlockSpec((1, 1, 1), lambda c, jb: (c, 0, 0)),
            scratch_shapes=[pltpu.VMEM((num_sites, tj), jnp.float32)],
        ),
        compiler_params=pltpu.CompilerParams(
            dimension_semantics=("parallel", "arbitrary")),
    )(xs, si_col, logfact, Wt, Xt, Ct)
    return jnp.sum(out) / num_cells


def logalike_ref(X, chars, Q, i, rho, S):
    """Vectorized pure-JAX reference mirroring the torch forward semantics."""
    num_cells, damb = X.shape
    sgn = jnp.concatenate([-jnp.ones((1,)), jnp.ones((damb - 1,))]).astype(X.dtype)
    inner = (X * sgn) @ X[i]
    arg = jnp.maximum(-inner / rho, 1.0 + 1e-7)
    dist = jnp.sqrt(rho) * jnp.arccosh(arg)
    P = jax.vmap(lambda t: jax.scipy.linalg.expm(Q * t))(dist / 2.0)   # (N, S, S)
    row0 = P[:, 0, :]
    diag = jnp.diagonal(P, axis1=1, axis2=2)
    si = chars[i]
    p0_si = row0[:, si]                                                # (N, ns)
    p0_sj = jnp.take_along_axis(row0, chars, axis=1)                   # (N, ns)
    pd_si = diag[:, si]
    eq_nz = (chars == si[None, :]) & (si[None, :] > 0)
    cur = (1.0 / S) * (p0_si * p0_sj + jnp.where(eq_nz, pd_si * pd_si, 0.0))
    mask = (jnp.arange(num_cells) != i)[:, None]
    total = jnp.sum(jnp.where(mask, jnp.log(cur), 0.0))
    return total / num_cells


if __name__ == "__main__":
    key = jax.random.PRNGKey(0)
    num_cells, num_sites = 200, 16
    S = 8          # states {0, 1, ..., 6, D}; 'D' never generated
    dim = 3        # Lorentz ambient dim = dim + 1
    rho = 1.0
    i = 2

    k1, k2, k3 = jax.random.split(key, 3)

    # Valid points on the Lorentz hyperboloid: x0 = sqrt(rho + ||x_rest||^2)
    rest = 0.5 * jax.random.normal(k1, (num_cells, dim), dtype=jnp.float32)
    x0 = jnp.sqrt(rho + jnp.sum(rest * rest, axis=1, keepdims=True))
    X = jnp.concatenate([x0, rest], axis=1)

    # Character matrix with states in 0..S-2 (no dropout states)
    chars = jax.random.randint(k2, (num_cells, num_sites), 0, S - 1).astype(jnp.int32)

    # Infinitesimal generator Q: positive off-diagonals, rows sum to zero
    off = jax.random.uniform(k3, (S, S), dtype=jnp.float32) / S
    off = off - jnp.diag(jnp.diag(off))
    Q = off - jnp.diag(jnp.sum(off, axis=1))

    out = jax.block_until_ready(logalike_pallas(X, chars, Q, i, rho, S, block_j=512))
    ref = jax.block_until_ready(logalike_ref(X, chars, Q, i, rho, S))

    assert jnp.isfinite(out), out
    assert jnp.allclose(out, ref, rtol=5e-3, atol=5e-3), (float(out), float(ref))
    print("KERNEL_OK")
</pallas_src>

<mosaic_0001>
module attributes {stable_mosaic.version = 11 : i64} {
  func.func @_logalike_kernel(%arg0: i32, %arg1: i32, %arg2: memref<8x1xf32, #tpu.memory_space<vmem>>, %arg3: memref<16x1xi32, #tpu.memory_space<vmem>>, %arg4: memref<24x1xf32, #tpu.memory_space<vmem>>, %arg5: memref<40x24xf32, #tpu.memory_space<vmem>>, %arg6: memref<8x256xf32, #tpu.memory_space<vmem>>, %arg7: memref<16x256xi32, #tpu.memory_space<vmem>>, %arg8: memref<1x1x1xf32, #tpu.memory_space<vmem>>, %arg9: memref<16x256xf32, #tpu.memory_space<vmem>>) attributes {dimension_semantics = [#tpu.dimension_semantics<parallel>, #tpu.dimension_semantics<arbitrary>], iteration_bounds = array<i64: 1, 1>, scalar_prefetch = 0 : i64, scratch_operands = 1 : i64, tpu.core_type = #tpu.core_type<tc>, window_params = [{pipeline_mode = #tpu.pipeline_mode<synchronous>, transform_indices = @transform_0, window_bounds = array<i64: 8, 1>}, {pipeline_mode = #tpu.pipeline_mode<synchronous>, transform_indices = @transform_1, window_bounds = array<i64: 16, 1>}, {pipeline_mode = #tpu.pipeline_mode<synchronous>, transform_indices = @transform_2, window_bounds = array<i64: 24, 1>}, {pipeline_mode = #tpu.pipeline_mode<synchronous>, transform_indices = @transform_3, window_bounds = array<i64: 40, 24>}, {transform_indices = @transform_4, window_bounds = array<i64: 8, 256>}, {transform_indices = @transform_5, window_bounds = array<i64: 16, 256>}, {transform_indices = @transform_6, window_bounds = array<i64: 1, 1, 1>}]} {
    %c0_i32 = arith.constant 0 : i32
    %0 = arith.cmpi eq, %arg1, %c0_i32 : i32
    %1 = arith.extui %0 : i1 to i32
    %c0_i32_0 = arith.constant 0 : i32
    %2 = arith.cmpi ne, %1, %c0_i32_0 : i32
    scf.if %2 {
      %cst_43 = arith.constant 0.000000e+00 : f32
      %147 = vector.broadcast %cst_43 : f32 to vector<16x256xf32>
      %c0_44 = arith.constant 0 : index
      %c0_45 = arith.constant 0 : index
      %148 = vector.load %arg9[%c0_44, %c0_45] : memref<16x256xf32, #tpu.memory_space<vmem>>, vector<16x256xf32>
      tpu.vector_store %arg9[%c0_44, %c0_45], %147 {strides = array<i32>} : memref<16x256xf32, #tpu.memory_space<vmem>>, vector<16x256xf32>,
    } else {
    }
    %c0 = arith.constant 0 : index
    %c0_1 = arith.constant 0 : index
    %3 = vector.load %arg6[%c0, %c0_1] : memref<8x256xf32, #tpu.memory_space<vmem>>, vector<8x256xf32>
    %c0_2 = arith.constant 0 : index
    %c0_3 = arith.constant 0 : index
    %4 = vector.load %arg2[%c0_2, %c0_3] : memref<8x1xf32, #tpu.memory_space<vmem>>, vector<8x1xf32>
    %5 = vector.broadcast %4 : vector<8x1xf32> to vector<8x256xf32>
    %6 = arith.mulf %5, %3 : vector<8x256xf32>
    %cst = arith.constant dense<0.000000e+00> : vector<256xf32>
    %7 = vector.multi_reduction <add>, %6, %cst [0] : vector<8x256xf32> to vector<256xf32>
    %8 = vector.shape_cast %7 : vector<256xf32> to vector<1x256xf32>
    %cst_4 = arith.constant 0.000000e+00 : f32
    %9 = vector.broadcast %cst_4 : f32 to vector<1x256xf32>
    %10 = arith.subf %9, %8 : vector<1x256xf32>
    %cst_5 = arith.constant 1.000000e+00 : f32
    %11 = vector.broadcast %cst_5 : f32 to vector<1x256xf32>
    %12 = arith.mulf %10, %11 : vector<1x256xf32>
    %cst_6 = arith.constant 1.000000e+00 : f32
    %13 = vector.broadcast %cst_6 : f32 to vector<1x256xf32>
    %14 = arith.subf %12, %13 : vector<1x256xf32>
    %cst_7 = arith.constant 1.000000e-07 : f32
    %15 = vector.broadcast %cst_7 : f32 to vector<1x256xf32>
    %16 = arith.maximumf %14, %15 : vector<1x256xf32>
    %cst_8 = arith.constant 2.000000e+00 : f32
    %17 = vector.broadcast %cst_8 : f32 to vector<1x256xf32>
    %18 = arith.addf %16, %17 : vector<1x256xf32>
    %19 = arith.mulf %16, %18 : vector<1x256xf32>
    %20 = math.sqrt %19 : vector<1x256xf32>
    %21 = arith.addf %16, %20 : vector<1x256xf32>
    %22 = math.log1p %21 : vector<1x256xf32>
    %cst_9 = arith.constant 1.000000e+00 : f32
    %23 = vector.broadcast %cst_9 : f32 to vector<1x256xf32>
    %24 = arith.mulf %23, %22 : vector<1x256xf32>
    %cst_10 = arith.constant 0.272588193 : f32
    %25 = vector.broadcast %cst_10 : f32 to vector<1x256xf32>
    %26 = arith.mulf %25, %24 : vector<1x256xf32>
    %cst_11 = arith.constant 1.000000e-30 : f32
    %27 = vector.broadcast %cst_11 : f32 to vector<1x256xf32>
    %28 = arith.maximumf %26, %27 : vector<1x256xf32>
    %29 = tpu.iota {dimensions = array<i32: 0>} : vector<24x256xi32>
    %30 = arith.sitofp %29 : vector<24x256xi32> to vector<24x256xf32>
    %31 = math.log %28 : vector<1x256xf32>
    %32 = vector.broadcast %31 : vector<1x256xf32> to vector<24x256xf32>
    %33 = arith.mulf %30, %32 : vector<24x256xf32>
    %34 = vector.broadcast %28 : vector<1x256xf32> to vector<24x256xf32>
    %35 = arith.subf %33, %34 : vector<24x256xf32>
    %c0_12 = arith.constant 0 : index
    %c0_13 = arith.constant 0 : index
    %36 = vector.load %arg4[%c0_12, %c0_13] : memref<24x1xf32, #tpu.memory_space<vmem>>, vector<24x1xf32>
    %37 = vector.broadcast %36 : vector<24x1xf32> to vector<24x256xf32>
    %38 = arith.subf %35, %37 : vector<24x256xf32>
    %39 = math.exp %38 : vector<24x256xf32>
    %c0_14 = arith.constant 0 : index
    %c0_15 = arith.constant 0 : index
    %40 = vector.load %arg5[%c0_14, %c0_15] : memref<40x24xf32, #tpu.memory_space<vmem>>, vector<40x24xf32>
    %cst_16 = arith.constant dense<0.000000e+00> : vector<40x256xf32>
    %41 = tpu.matmul %40, %39, %cst_16 {dimension_numbers = #tpu.dot_dimension_numbers<[1], [0], [0], [1], [0, 0, 1, 1], [], []>} : vector<40x24xf32>, vector<24x256xf32>, vector<40x256xf32> -> vector<40x256xf32>
    %42 = vector.extract_strided_slice %41 {offsets = [0, 0], sizes = [8, 256], strides = [1, 1]} : vector<40x256xf32> to vector<8x256xf32>
    %43 = vector.extract_strided_slice %41 {offsets = [8, 0], sizes = [16, 256], strides = [1, 1]} : vector<40x256xf32> to vector<16x256xf32>
    %44 = vector.extract_strided_slice %41 {offsets = [24, 0], sizes = [16, 256], strides = [1, 1]} : vector<40x256xf32> to vector<16x256xf32>
    %c0_17 = arith.constant 0 : index
    %c0_18 = arith.constant 0 : index
    %45 = vector.load %arg7[%c0_17, %c0_18] : memref<16x256xi32, #tpu.memory_space<vmem>>, vector<16x256xi32>
    %cst_19 = arith.constant 0.000000e+00 : f32
    %46 = vector.broadcast %cst_19 : f32 to vector<16x256xf32>
    %c0_i32_20 = arith.constant 0 : i32
    %47 = vector.broadcast %c0_i32_20 : i32 to vector<16x256xi32>
    %48 = arith.cmpi eq, %45, %47 : vector<16x256xi32>
    %49 = vector.extract_strided_slice %42 {offsets = [0, 0], sizes = [1, 256], strides = [1, 1]} : vector<8x256xf32> to vector<1x256xf32>
    %cst_21 = arith.constant 0.000000e+00 : f32
    %50 = vector.shape_cast %49 : vector<1x256xf32> to vector<1x256xf32>
    %51 = vector.broadcast %50 : vector<1x256xf32> to vector<16x256xf32>
    %52 = vector.broadcast %cst_21 : f32 to vector<16x256xf32>
    %53 = arith.select %48, %51, %52 : vector<16x256xi1>, vector<16x256xf32>
    %54 = arith.addf %46, %53 : vector<16x256xf32>
    %c1_i32 = arith.constant 1 : i32
    %55 = vector.broadcast %c1_i32 : i32 to vector<16x256xi32>
    %56 = arith.cmpi eq, %45, %55 : vector<16x256xi32>
    %57 = vector.extract_strided_slice %42 {offsets = [1, 0], sizes = [1, 256], strides = [1, 1]} : vector<8x256xf32> to vector<1x256xf32>
    %cst_22 = arith.constant 0.000000e+00 : f32
    %58 = vector.shape_cast %57 : vector<1x256xf32> to vector<1x256xf32>
    %59 = vector.broadcast %58 : vector<1x256xf32> to vector<16x256xf32>
    %60 = vector.broadcast %cst_22 : f32 to vector<16x256xf32>
    %61 = arith.select %56, %59, %60 : vector<16x256xi1>, vector<16x256xf32>
    %62 = arith.addf %54, %61 : vector<16x256xf32>
    %c2_i32 = arith.constant 2 : i32
    %63 = vector.broadcast %c2_i32 : i32 to vector<16x256xi32>
    %64 = arith.cmpi eq, %45, %63 : vector<16x256xi32>
    %65 = vector.extract_strided_slice %42 {offsets = [2, 0], sizes = [1, 256], strides = [1, 1]} : vector<8x256xf32> to vector<1x256xf32>
    %cst_23 = arith.constant 0.000000e+00 : f32
    %66 = vector.shape_cast %65 : vector<1x256xf32> to vector<1x256xf32>
    %67 = vector.broadcast %66 : vector<1x256xf32> to vector<16x256xf32>
    %68 = vector.broadcast %cst_23 : f32 to vector<16x256xf32>
    %69 = arith.select %64, %67, %68 : vector<16x256xi1>, vector<16x256xf32>
    %70 = arith.addf %62, %69 : vector<16x256xf32>
    %c3_i32 = arith.constant 3 : i32
    %71 = vector.broadcast %c3_i32 : i32 to vector<16x256xi32>
    %72 = arith.cmpi eq, %45, %71 : vector<16x256xi32>
    %73 = vector.extract_strided_slice %42 {offsets = [3, 0], sizes = [1, 256], strides = [1, 1]} : vector<8x256xf32> to vector<1x256xf32>
    %cst_24 = arith.constant 0.000000e+00 : f32
    %74 = vector.shape_cast %73 : vector<1x256xf32> to vector<1x256xf32>
    %75 = vector.broadcast %74 : vector<1x256xf32> to vector<16x256xf32>
    %76 = vector.broadcast %cst_24 : f32 to vector<16x256xf32>
    %77 = arith.select %72, %75, %76 : vector<16x256xi1>, vector<16x256xf32>
    %78 = arith.addf %70, %77 : vector<16x256xf32>
    %c4_i32 = arith.constant 4 : i32
    %79 = vector.broadcast %c4_i32 : i32 to vector<16x256xi32>
    %80 = arith.cmpi eq, %45, %79 : vector<16x256xi32>
    %81 = vector.extract_strided_slice %42 {offsets = [4, 0], sizes = [1, 256], strides = [1, 1]} : vector<8x256xf32> to vector<1x256xf32>
    %cst_25 = arith.constant 0.000000e+00 : f32
    %82 = vector.shape_cast %81 : vector<1x256xf32> to vector<1x256xf32>
    %83 = vector.broadcast %82 : vector<1x256xf32> to vector<16x256xf32>
    %84 = vector.broadcast %cst_25 : f32 to vector<16x256xf32>
    %85 = arith.select %80, %83, %84 : vector<16x256xi1>, vector<16x256xf32>
    %86 = arith.addf %78, %85 : vector<16x256xf32>
    %c5_i32 = arith.constant 5 : i32
    %87 = vector.broadcast %c5_i32 : i32 to vector<16x256xi32>
    %88 = arith.cmpi eq, %45, %87 : vector<16x256xi32>
    %89 = vector.extract_strided_slice %42 {offsets = [5, 0], sizes = [1, 256], strides = [1, 1]} : vector<8x256xf32> to vector<1x256xf32>
    %cst_26 = arith.constant 0.000000e+00 : f32
    %90 = vector.shape_cast %89 : vector<1x256xf32> to vector<1x256xf32>
    %91 = vector.broadcast %90 : vector<1x256xf32> to vector<16x256xf32>
    %92 = vector.broadcast %cst_26 : f32 to vector<16x256xf32>
    %93 = arith.select %88, %91, %92 : vector<16x256xi1>, vector<16x256xf32>
    %94 = arith.addf %86, %93 : vector<16x256xf32>
    %c6_i32 = arith.constant 6 : i32
    %95 = vector.broadcast %c6_i32 : i32 to vector<16x256xi32>
    %96 = arith.cmpi eq, %45, %95 : vector<16x256xi32>
    %97 = vector.extract_strided_slice %42 {offsets = [6, 0], sizes = [1, 256], strides = [1, 1]} : vector<8x256xf32> to vector<1x256xf32>
    %cst_27 = arith.constant 0.000000e+00 : f32
    %98 = vector.shape_cast %97 : vector<1x256xf32> to vector<1x256xf32>
    %99 = vector.broadcast %98 : vector<1x256xf32> to vector<16x256xf32>
    %100 = vector.broadcast %cst_27 : f32 to vector<16x256xf32>
    %101 = arith.select %96, %99, %100 : vector<16x256xi1>, vector<16x256xf32>
    %102 = arith.addf %94, %101 : vector<16x256xf32>
    %c7_i32 = arith.constant 7 : i32
    %103 = vector.broadcast %c7_i32 : i32 to vector<16x256xi32>
    %104 = arith.cmpi eq, %45, %103 : vector<16x256xi32>
    %105 = vector.extract_strided_slice %42 {offsets = [7, 0], sizes = [1, 256], strides = [1, 1]} : vector<8x256xf32> to vector<1x256xf32>
    %cst_28 = arith.constant 0.000000e+00 : f32
    %106 = vector.shape_cast %105 : vector<1x256xf32> to vector<1x256xf32>
    %107 = vector.broadcast %106 : vector<1x256xf32> to vector<16x256xf32>
    %108 = vector.broadcast %cst_28 : f32 to vector<16x256xf32>
    %109 = arith.select %104, %107, %108 : vector<16x256xi1>, vector<16x256xf32>
    %110 = arith.addf %102, %109 : vector<16x256xf32>
    %c0_29 = arith.constant 0 : index
    %c0_30 = arith.constant 0 : index
    %111 = vector.load %arg3[%c0_29, %c0_30] : memref<16x1xi32, #tpu.memory_space<vmem>>, vector<16x1xi32>
    %112 = vector.broadcast %111 : vector<16x1xi32> to vector<16x256xi32>
    %113 = arith.cmpi eq, %45, %112 : vector<16x256xi32>
    %c0_i32_31 = arith.constant 0 : i32
    %114 = vector.broadcast %c0_i32_31 : i32 to vector<16x1xi32>
    %115 = arith.cmpi sgt, %111, %114 : vector<16x1xi32>
    %116 = vector.broadcast %115 : vector<16x1xi1> to vector<16x256xi1>
    %117 = arith.andi %113, %116 : vector<16x256xi1>
    %118 = arith.mulf %43, %110 : vector<16x256xf32>
    %119 = arith.mulf %44, %44 : vector<16x256xf32>
    %cst_32 = arith.constant 0.000000e+00 : f32
    %120 = vector.broadcast %cst_32 : f32 to vector<16x256xf32>
    %121 = arith.select %117, %119, %120 : vector<16x256xi1>, vector<16x256xf32>
    %122 = arith.addf %118, %121 : vector<16x256xf32>
    %cst_33 = arith.constant 1.250000e-01 : f32
    %123 = vector.broadcast %cst_33 : f32 to vector<16x256xf32>
    %124 = arith.mulf %123, %122 : vector<16x256xf32>
    %c1_i32_34 = arith.constant 1 : i32
    %125 = arith.muli %arg0, %c1_i32_34 : i32
    %126 = arith.addi %125, %arg1 : i32
    %c256_i32 = arith.constant 256 : i32
    %127 = arith.muli %126, %c256_i32 : i32
    %128 = tpu.iota {dimensions = array<i32: 1>} : vector<1x256xi32>
    %129 = vector.broadcast %127 : i32 to vector<1x256xi32>
    %130 = arith.addi %129, %128 : vector<1x256xi32>
    %c2_i32_35 = arith.constant 2 : i32
    %131 = vector.broadcast %c2_i32_35 : i32 to vector<1x256xi32>
    %132 = arith.cmpi ne, %130, %131 : vector<1x256xi32>
    %c200_i32 = arith.constant 200 : i32
    %133 = vector.broadcast %c200_i32 : i32 to vector<1x256xi32>
    %134 = arith.cmpi slt, %130, %133 : vector<1x256xi32>
    %135 = arith.andi %132, %134 : vector<1x256xi1>
    %c0_36 = arith.constant 0 : index
    %c0_37 = arith.constant 0 : index
    %136 = vector.load %arg9[%c0_36, %c0_37] : memref<16x256xf32, #tpu.memory_space<vmem>>, vector<16x256xf32>
    %cst_38 = arith.constant 1.000000e+00 : f32
    %137 = vector.shape_cast %135 : vector<1x256xi1> to vector<1x256xi1>
    %138 = vector.broadcast %137 : vector<1x256xi1> to vector<16x256xi1>
    %139 = vector.broadcast %cst_38 : f32 to vector<16x256xf32>
    %140 = arith.select %138, %124, %139 : vector<16x256xi1>, vector<16x256xf32>
    %141 = math.log %140 : vector<16x256xf32>
    %142 = arith.addf %136, %141 : vector<16x256xf32>
    %c0_39 = arith.constant 0 : index
    %c0_40 = arith.constant 0 : index
    %143 = vector.load %arg9[%c0_39, %c0_40] : memref<16x256xf32, #tpu.memory_space<vmem>>, vector<16x256xf32>
    tpu.vector_store %arg9[%c0_39, %c0_40], %142 {strides = array<i32>} : memref<16x256xf32, #tpu.memory_space<vmem>>, vector<16x256xf32>,
    %c0_i32_41 = arith.constant 0 : i32
    %144 = arith.cmpi eq, %arg1, %c0_i32_41 : i32
    %145 = arith.extui %144 : i1 to i32
    %c0_i32_42 = arith.constant 0 : i32
    %146 = arith.cmpi ne, %145, %c0_i32_42 : i32
    scf.if %146 {
      %c0_43 = arith.constant 0 : index
      %c0_44 = arith.constant 0 : index
      %147 = vector.load %arg9[%c0_43, %c0_44] : memref<16x256xf32, #tpu.memory_space<vmem>>, vector<16x256xf32>
      %148 = vector.shape_cast %147 : vector<16x256xf32> to vector<1x16x256xf32>
      %cst_45 = arith.constant dense<0.000000e+00> : vector<1xf32>
      %149 = vector.multi_reduction <add>, %148, %cst_45 [1, 2] : vector<1x16x256xf32> to vector<1xf32>
      %150 = vector.shape_cast %149 : vector<1xf32> to vector<1x1x1xf32>
      %151 = vector.extract %150[0, 0, 0] : f32 from vector<1x1x1xf32>
      %152 = vector.broadcast %151 : f32 to vector<1x1xf32>
      %153 = vector.shape_cast %152 : vector<1x1xf32> to vector<1x1x1xf32>
      %c0_46 = arith.constant 0 : index
      %c0_47 = arith.constant 0 : index
      %c0_48 = arith.constant 0 : index
      %154 = vector.load %arg8[%c0_46, %c0_47, %c0_48] : memref<1x1x1xf32, #tpu.memory_space<vmem>>, vector<1x1x1xf32>
      tpu.vector_store %arg8[%c0_46, %c0_47, %c0_48], %153 {strides = array<i32>} : memref<1x1x1xf32, #tpu.memory_space<vmem>>, vector<1x1x1xf32>,
    } else {
    }
    return
  }
  func.func @transform_0(%arg0: i32, %arg1: i32) -> (i32, i32) {
    %c0_i32 = arith.constant 0 : i32
    %c0_i32_0 = arith.constant 0 : i32
    %c0_i32_1 = arith.constant 0 : i32
    return %c0_i32, %c0_i32_0 : i32, i32
  }
  func.func @transform_1(%arg0: i32, %arg1: i32) -> (i32, i32) {
    %c0_i32 = arith.constant 0 : i32
    %c0_i32_0 = arith.constant 0 : i32
    %c0_i32_1 = arith.constant 0 : i32
    return %c0_i32, %c0_i32_0 : i32, i32
  }
  func.func @transform_2(%arg0: i32, %arg1: i32) -> (i32, i32) {
    %c0_i32 = arith.constant 0 : i32
    %c0_i32_0 = arith.constant 0 : i32
    %c0_i32_1 = arith.constant 0 : i32
    return %c0_i32, %c0_i32_0 : i32, i32
  }
  func.func @transform_3(%arg0: i32, %arg1: i32) -> (i32, i32) {
    %c0_i32 = arith.constant 0 : i32
    %c0_i32_0 = arith.constant 0 : i32
    %c0_i32_1 = arith.constant 0 : i32
    return %c0_i32, %c0_i32_0 : i32, i32
  }
  func.func @transform_4(%arg0: i32, %arg1: i32) -> (i32, i32) {
    %c1_i32 = arith.constant 1 : i32
    %0 = arith.muli %arg0, %c1_i32 : i32
    %1 = arith.addi %0, %arg1 : i32
    %c0_i32 = arith.constant 0 : i32
    %c0_i32_0 = arith.constant 0 : i32
    return %c0_i32, %1 : i32, i32
  }
  func.func @transform_5(%arg0: i32, %arg1: i32) -> (i32, i32) {
    %c1_i32 = arith.constant 1 : i32
    %0 = arith.muli %arg0, %c1_i32 : i32
    %1 = arith.addi %0, %arg1 : i32
    %c0_i32 = arith.constant 0 : i32
    %c0_i32_0 = arith.constant 0 : i32
    return %c0_i32, %1 : i32, i32
  }
  func.func @transform_6(%arg0: i32, %arg1: i32) -> (i32, i32, i32) {
    %c0_i32 = arith.constant 0 : i32
    %c0_i32_0 = arith.constant 0 : i32
    %c0_i32_1 = arith.constant 0 : i32
    return %arg0, %c0_i32, %c0_i32_0 : i32, i32, i32
  }
}

</mosaic_0001>

<bundles_post_ra>
// kernel: tpu_custom_call.1
= control target key start
LH: loop header
LB: loop body
LE: loop exit
PB: predicated region body
PF: predicated region fallthrough
CT: control target
= control target key end

     0   :  { %v697_v2 = vmov 0   ;;  %s1039_s0 = inlined_call_operand.vmem [shape: f32[8,1], index: 0, kind: input, shape index: {}]   ;;  %s1040_s1 = inlined_call_operand.vmem [shape: s32[16,1], index: 1, kind: input, shape index: {}]   ;;  %s1041_s2 = inlined_call_operand.vmem [shape: f32[24,1], index: 2, kind: input, shape index: {}]   ;;  %s1042_s3 = inlined_call_operand.vmem [shape: f32[40,24], index: 3, kind: input, shape index: {}]   ;;  %s1043_s4 = inlined_call_operand.vmem [shape: f32[8,256], index: 4, kind: input, shape index: {}]   ;;  %s1044_s5 = inlined_call_operand.vmem [shape: s32[16,256], index: 5, kind: input, shape index: {}]   ;;  %s1045_s6 = inlined_call_operand.hbm [shape: f32[1,1,1], index: 6, kind: output, shape index: {}]  }
   0x1   :  { %v170_v0 = vld [vmem:[%s1041_s2 + $0x8] sm:$0xff]  ;;  %v78_v1 = vld [vmem:[%s1039_s0] sm:$0xff]  ;;  %642 = vset.pattern.permute.xlu1 %v697_v2  ;;  %641 = vset.pattern.permute.xlu0 %v697_v2 }
   0x2   :  { %v485_v3 = vld [vmem:[%s1040_s1] sm:$0xff]  ;;  %179 = vperm.xlu1 %642, %v170_v0   ;;  %81 = vperm.xlu0 %641, %v78_v1  }
   0x3   :  { %11 = vsyncpa [#allocation4], 0  ;;  %v169_v4 = vld [vmem:[%s1041_s2] sm:$0xff]  ;;  %v171_v5 = vld [vmem:[%s1041_s2 + $0x10] sm:$0xff]  ;;  %vm497_vm0 = vcmp.gt.s32.totalorder %v485_v3, 0  ;;  %v698_v9 = vmov 0.0  }
   0x4   :  { %v486_v6 = vld [vmem:[%s1040_s1 + $0x8] sm:$0xff]  ;;  %v499_v7 = vsel %vm497_vm0, 1, %v697_v2  ;;  %290 = vmatprep.mubr.f32.mxu0 %v698_v9  ;;  %308 = vmatprep.mubr.f32.mxu1 %v698_v9  ;;  %v76_v10 = vld [vmem:[%s1043_s4] sm:$0xff]  ;;  %vm210_vm8 = vcmask 195584  }
   0x5   :  { %vm498_vm1 = vcmp.gt.s32.totalorder %v486_v6, 0  ;;  %v77_v11 = vld [vmem:[%s1043_s4 + $0x8] sm:$0xff] }
   0x6   :  { %174 = vperm.xlu1 %642, %v169_v4   ;;  %184 = vperm.xlu0 %641, %v171_v5   ;;  %v500_v8 = vsel %vm498_vm1, 1, %v697_v2  ;;  %v146_v5 = vlaneseq }
   0xa   :  { %502 = vperm.xlu1 %642, %v499_v7   ;;  %488 = vperm.xlu0 %641, %v485_v3  }
   0xe   :  { %505 = vperm.xlu1 %642, %v500_v8   ;;  %491 = vperm.xlu0 %641, %v486_v6   ;;  %v762_v6 = vshrl.u32 %v146_v5, 7 }
  0x10   :  { %v148_v7 = vadd.s32 8, %v762_v6  ;;  %v149_v8 = vadd.s32 16, %v762_v6 }
  0x7d   :  { %v82_v12 = vpop.permute.xlu0 %81 }
  0x7e   :  { %v84_v13 = vmul.f32 %v82_v12, %v76_v10  ;;  %v85_v14 = vmul.f32 %v82_v12, %v77_v11  ;;  %v151_v10 = vcvt.s32.f32 %v148_v7  ;;  %v152_v11 = vcvt.s32.f32 %v149_v8  ;;  %v823_v8 = vld [vmem:[%s1044_s5 + $0x10] sm:$0xff] }
  0x80   :  { %v86_v15 = vrot.slane %v84_v13, 4  ;;  %v92_v16 = vrot.slane %v85_v14, 4 }
  0x82   :  { %v87_v17 = vadd.f32 %v86_v15, %v84_v13  ;;  %v93_v18 = vadd.f32 %v92_v16, %v85_v14  ;;  %v150_v13 = vcvt.s32.f32 %v762_v6 }
  0x84   :  { %v88_v19 = vrot.slane %v87_v17, 2  ;;  %v94_v20 = vrot.slane %v93_v18, 2 }
  0x86   :  { %v89_v21 = vadd.f32 %v88_v19, %v87_v17  ;;  %v95_v22 = vadd.f32 %v94_v20, %v93_v18 }
  0x88   :  { %v90_v23 = vrot.slane %v89_v21, 1  ;;  %v96_v24 = vrot.slane %v95_v22, 1 }
  0x8a   :  { %v91_v25 = vadd.f32 %v90_v23, %v89_v21  ;;  %v97_v26 = vadd.f32 %v96_v24, %v95_v22  ;;  %v180_v22 = vpop.permute.xlu1 %179 }
  0x8c   :  { %v98_v27 = vsub.f32 0.0, %v91_v25  ;;  %v99_v28 = vsub.f32 0.0, %v97_v26  ;;  %v185_v26 = vpop.permute.xlu0 %184 }
  0x8e   :  { %v623_v29 = vadd.f32 -1.0, %v98_v27  ;;  %v624_v30 = vadd.f32 -1.0, %v99_v28 }
  0x90   :  { %v102_v31 = vmax.f32 %v623_v29, 1e-07  ;;  %v103_v32 = vmax.f32 %v624_v30, 1e-07  ;;  %v818_v7 = vpop.permute.xlu0 %488 }
  0x92   :  { %v104_v33 = vadd.f32 2.0, %v102_v31  ;;  %v105_v34 = vadd.f32 2.0, %v103_v32 }
  0x94   :  { %v106_v35 = vmul.f32 %v104_v33, %v102_v31  ;;  %v107_v36 = vmul.f32 %v105_v34, %v103_v32  ;;  %v175_v34 = vpop.permute.xlu1 %174 }
  0x96   :  { %643 = vrsqrt.f32 %v106_v35  ;;  %vm110_vm2 = vcmp.eq.f32.partialorder %v106_v35, inf  ;;  %v113_v40 = vand.u32 2147483648, %v106_v35  ;;  %vm112_vm3 = vcmp.eq.f32.partialorder %v106_v35, 0.0 }
  0x97   :  { %645 = vrsqrt.f32 %v107_v36  ;;  %vm117_vm4 = vcmp.eq.f32.partialorder %v107_v36, inf  ;;  %v120_v43 = vand.u32 2147483648, %v107_v36  ;;  %vm119_vm5 = vcmp.eq.f32.partialorder %v107_v36, 0.0 }
  0xa3   :  { %v644_v37 = vpop.eup %643 }
  0xa4   :  { %v646_v38 = vpop.eup %645  ;;  %v109_v39 = vmul.f32 %v644_v37, %v106_v35 }
  0xa5   :  { %v116_v41 = vmul.f32 %v646_v38, %v107_v36 }
  0xa6   :  { %v111_v42 = vsel %vm110_vm2, %v106_v35, %v109_v39 }
  0xa7   :  { %v114_v44 = vsel %vm112_vm3, %v113_v40, %v111_v42  ;;  %v118_v45 = vsel %vm117_vm4, %v107_v36, %v116_v41 }
  0xa8   :  { %v121_v46 = vsel %vm119_vm5, %v120_v43, %v118_v45  ;;  %v122_v47 = vadd.f32 %v114_v44, %v102_v31 }
  0xa9   :  { %v123_v48 = vadd.f32 %v121_v46, %v103_v32 }
  0xaa   :  { %v124_v49 = vadd.f32 1.0, %v122_v47  ;;  %v127_v51 = vmul.f32 -0.5, %v122_v47  ;;  %v130_v54 = vand.u32 2147483647, %v122_v47 }
  0xab   :  { %v133_v50 = vadd.f32 1.0, %v123_v48  ;;  %v136_v52 = vmul.f32 -0.5, %v123_v48  ;;  %v139_v56 = vand.u32 2147483647, %v123_v48 }
  0xac   :  { %647 = vlog2.f32 %v124_v49  ;;  %v128_v53 = vadd.f32 1.0, %v127_v51  ;;  %vm131_vm6 = vcmp.lt.f32.partialorder %v130_v54, 0.0004427343  ;;  %v205_v49 = vld [vmem:[%s1042_s3] sm:$0xff]  ;;  %v207_v54 = vld [vmem:[%s1042_s3 + $0x10] sm:$0xff] }
  0xad   :  { %649 = vlog2.f32 %v133_v50  ;;  %v137_v55 = vadd.f32 1.0, %v136_v52  ;;  %vm140_vm7 = vcmp.lt.f32.partialorder %v139_v56, 0.0004427343  ;;  %v208_v50 = vld [vmem:[%s1042_s3 + $0x18] sm:$0xff]  ;;  %v209_v52 = vld [vmem:[%s1042_s3 + $0x20] sm:$0xff]  ;;  %v351_v56 = vsub.s32 1, %v762_v6 }
  0xae   :  { %v129_v60 = vmul.f32 %v128_v53, %v122_v47  ;;  %v206_v53 = vld [vmem:[%s1042_s3 + $0x8] sm:$0xff] }
  0xaf   :  { %v138_v62 = vmul.f32 %v137_v55, %v123_v48  ;;  %v331_v55 = vsub.s32 0, %v762_v6 }
  0xb9   :  { %v648_v57 = vpop.eup %647 }
  0xba   :  { %v650_v58 = vpop.eup %649  ;;  %v126_v59 = vmul.f32 0.6931472, %v648_v57  ;;  %v371_v57 = vsub.s32 2, %v762_v6 }
  0xbb   :  { %v135_v61 = vmul.f32 0.6931472, %v650_v58  ;;  %v796_v58 = vld [vmem:[%s1044_s5] sm:$0xff] }
  0xbc   :  { %v132_v63 = vsel %vm131_vm6, %v129_v60, %v126_v59  ;;  %v391_v59 = vsub.s32 3, %v762_v6  ;;  %vm325_vm9 = vcmp.eq.s32.totalorder %v796_v58, 0  ;;  %v431_v60 = vsub.s32 5, %v762_v6 }
  0xbd   :  { %v141_v0 = vsel %vm140_vm7, %v138_v62, %v135_v61  ;;  %v142_v1 = vmul.f32 0.2725882, %v132_v63  ;;  %v451_v61 = vsub.s32 6, %v762_v6  ;;  %v471_v62 = vsub.s32 7, %v762_v6 }
  0xbe   :  { %v143_v2 = vmul.f32 0.2725882, %v141_v0  ;;  %vm345_vm10 = vcmp.eq.s32.totalorder %v796_v58, 1  ;;  %vm365_vm11 = vcmp.eq.s32.totalorder %v796_v58, 2  ;;  %vm385_vm12 = vcmp.eq.s32.totalorder %v796_v58, 3  ;;  %v811_v0 = vld [vmem:[%s1044_s5 + $0x8] sm:$0xff] }
  0xbf   :  { %v144_v3 = vmax.f32 %v142_v1, 1e-30  ;;  %vm405_vm13 = vcmp.eq.s32.totalorder %v796_v58, 4  ;;  %vm425_vm14 = vcmp.eq.s32.totalorder %v796_v58, 5  ;;  %vm445_vm15 = vcmp.eq.s32.totalorder %v796_v58, 6 }
  0xc0   :  { %v145_v4 = vmax.f32 %v143_v2, 1e-30  ;;  %vm326_vm1 = vcmp.eq.s32.totalorder %v811_v0, 0  ;;  %vm346_vm2 = vcmp.eq.s32.totalorder %v811_v0, 1  ;;  %vm366_vm3 = vcmp.eq.s32.totalorder %v811_v0, 2 }
  0xc1   :  { %651 = vlog2.f32 %v144_v3  ;;  %vm386_vm4 = vcmp.eq.s32.totalorder %v811_v0, 3  ;;  %vm327_vm6 = vcmp.eq.s32.totalorder %v823_v8, 0  ;;  %vm407_vm7 = vcmp.eq.s32.totalorder %v823_v8, 4 }
  0xc2   :  { %653 = vlog2.f32 %v145_v4 }
  0xce   :  { %v652_v12 = vpop.eup %651 }
  0xcf   :  { %v654_v14 = vpop.eup %653  ;;  %v154_v15 = vmul.f32 0.6931472, %v652_v12 }
  0xd0   :  { %v156_v16 = vmul.f32 0.6931472, %v654_v14  ;;  %v844_v14 = vld [vmem:[%s1044_s5 + $0x18] sm:$0xff]  ;;  %s699_s5 = smov [#allocation3]  }
  0xd1   :  { %v159_v17 = vmul.f32 %v154_v15, %v151_v10  ;;  %v161_v18 = vmul.f32 %v154_v15, %v152_v11  ;;  %v157_v23 = vmul.f32 %v154_v15, %v150_v13  ;;  %vm348_vm5 = vcmp.eq.s32.totalorder %v844_v14, 1  ;;  %s603_s26 = sshll.u32 %s699_s5, 4  ;;  %s604_s26 = int_to_ptr.vmem [resolvable:$true] %s603_s26 }
  0xd2   :  { %v158_v19 = vmul.f32 %v156_v16, %v150_v13  ;;  %v160_v20 = vmul.f32 %v156_v16, %v151_v10  ;;  %v162_v21 = vmul.f32 %v156_v16, %v152_v11  ;;  %vm368_vm0 = vcmp.eq.s32.totalorder %v844_v14, 2  ;;  %s675_s28 = scalar_lea.vmem %s604_s26, 16  ;;  %s679_s29 = scalar_lea.vmem %s604_s26, 32 }
  0xd3   :  { %v167_v24 = vsub.f32 %v161_v18, %v144_v3  ;;  %v165_v28 = vsub.f32 %v159_v17, %v144_v3  ;;  %v163_v32 = vsub.f32 %v157_v23, %v144_v3  ;;  %p676_p0 = scmp.ne.s32.totalorder %s604_s26, %s675_s28  ;;  %p680_p1 = scmp.lt.s32.totalorder %s604_s26, %s604_s26 }
  0xd4   :  { %v166_v25 = vsub.f32 %v160_v20, %v145_v4  ;;  %v168_v27 = vsub.f32 %v162_v21, %v145_v4  ;;  %v164_v30 = vsub.f32 %v158_v19, %v145_v4  ;;  %v816_v4 = vpop.permute.xlu1 %502  ;;  %p681_p2 = scmp.lt.s32.totalorder %s679_s29, %s675_s28 }
  0xd5   :  { %v191_v29 = vsub.f32 %v167_v24, %v185_v26  ;;  %v189_v35 = vsub.f32 %v165_v28, %v180_v22  ;;  %v187_v39 = vsub.f32 %v163_v32, %v175_v34 }
  0xd6   :  { %v192_v31 = vsub.f32 %v168_v27, %v185_v26  ;;  %v190_v33 = vsub.f32 %v166_v25, %v180_v22  ;;  %v188_v37 = vsub.f32 %v164_v30, %v175_v34  ;;  %p682_p3 = por %p681_p2, %p680_p1 }
  0xd7   :  { %v201_v36 = vmul.f32 1.442695, %v191_v29  ;;  %v197_v41 = vmul.f32 1.442695, %v189_v35  ;;  %v193_v43 = vmul.f32 1.442695, %v187_v39 }
  0xd8   :  { %v203_v38 = vmul.f32 1.442695, %v192_v31  ;;  %v199_v40 = vmul.f32 1.442695, %v190_v33  ;;  %v195_v42 = vmul.f32 1.442695, %v188_v37  ;;  %p683_p4 = pnand %p682_p3, %p676_p0 }
  0xd9   :  { %655 = vpow2.f32 %v201_v36 }
  0xda   :  { %657 = vpow2.f32 %v203_v38 }
  0xdb   :  { %659 = vpow2.f32 %v199_v40 }
  0xdc   :  { %661 = vpow2.f32 %v197_v41 }
  0xdd   :  { %663 = vpow2.f32 %v195_v42 }
  0xde   :  { %665 = vpow2.f32 %v193_v43  ;;  %v923_v43 = vand.u32 127, %v146_v5 }
  0xe6   :  { %v656_v44 = vpop.eup %655 }
  0xe7   :  { %v658_v45 = vpop.eup %657 }
  0xe8   :  { %252 = vmatprep.subr.mxu0 %v658_v45  ;;  %630 = vmatprep.subr.mxu1 %v658_v45  ;;  %v660_v46 = vpop.eup %659  ;;  %v928_v45 = vpop.permute.xlu1 %505 }
  0xe9   :  { %253 = vmatpush1.msra.mxu0 %v656_v44  ;;  %633 = vmatpush1.msra.mxu1 %v656_v44  ;;  %v662_v47 = vpop.eup %661 }
  0xea   :  { %254 = vmatprep.subr.mxu0 %v660_v46  ;;  %631 = vmatprep.subr.mxu1 %v660_v46  ;;  %v664_v48 = vpop.eup %663  ;;  %v930_v46 = vpop.permute.xlu0 %491 }
  0xeb   :  { %255 = vmatpush1.msra.mxu0 %v662_v47  ;;  %634 = vmatpush1.msra.mxu1 %v662_v47  ;;  %v666_v51 = vpop.eup %665 }
  0xec   :  { %256 = vmatprep.subr.mxu0 %v664_v48  ;;  %632 = vmatprep.subr.mxu1 %v664_v48 }
  0xed   :  { %257 = vmatpush1.msra.mxu0 %v666_v51  ;;  %635 = vmatpush1.msra.mxu1 %v666_v51 }
  0xee   :  { %625 = vmatmul.mubr.msk.f32.vlgmr.msra.gmra.mxu0 %vm210_vm8, %v205_v49  ;;  %628 = vmatmul.mubr.msk.f32.vlgmr.msra.gmra.mxu1 %vm210_vm8, %v208_v50 }
  0xef   :  { %314 = vmatprep.mubr.f32.mxu1 %v698_v9  ;;  %296 = vmatprep.mubr.f32.mxu0 %v698_v9 }
  0xf2   :  { %629 = vmatmul.mubr.msk.f32.gmra.mxu1 %vm210_vm8, %v209_v52  ;;  %626 = vmatmul.mubr.msk.f32.gmra.mxu0 %vm210_vm8, %v206_v53 }
  0xf3   :  { %302 = vmatprep.mubr.f32.mxu0 %v698_v9  ;;  %v411_v9 = vsub.s32 4, %v762_v6 }
  0xf6   :  { %627 = vmatmul.mubr.msk.f32.gmra.mxu0 %vm210_vm8, %v207_v54  ;;  %vm347_vm8 = vcmp.eq.s32.totalorder %v823_v8, 1 }
 0x1ae   :  { %v292_v63 = vpop.f32.mrf.mxu0  ;;  %v310_v28 = vpop.f32.mrf.mxu1 }
 0x1af   :  { %v332_v1 = vrot.slane %v292_v63, %v331_v55  ;;  %v352_v2 = vrot.slane %v292_v63, %v351_v56  ;;  %v813_v3 = vrot.slane %v292_v63, %v371_v57  ;;  %v837_v13 = vrot.slane %v292_v63, %v391_v59 }
 0x1b0   :  { %v831_v10 = vpop.f32.mrf.mxu0  ;;  %v857_v17 = vrot.slane %v292_v63, %v411_v9  ;;  %v863_v19 = vrot.slane %v292_v63, %v431_v60  ;;  %v889_v30 = vrot.slane %v292_v63, %v451_v61  ;;  %v893_v31 = vrot.slane %v292_v63, %v471_v62  ;;  %v312_v6 = vpop.f32.mrf.mxu1 }
 0x1b1   :  { %v337_v11 = vsel %vm325_vm9, %v332_v1, 0.0  ;;  %v357_v12 = vsel %vm345_vm10, %v352_v2, 0.0  ;;  %vm367_vm9 = vcmp.eq.s32.totalorder %v823_v8, 2  ;;  %vm507_vm10 = vcmp.eq.s32.totalorder %v816_v4, 1 }
 0x1b2   :  { %v361_v15 = vadd.f32 %v357_v12, %v337_v11  ;;  %v377_v16 = vsel %vm365_vm11, %v813_v3, 0.0  ;;  %v336_v20 = vrot.slane %v831_v10, %v331_v55  ;;  %v356_v21 = vrot.slane %v831_v10, %v351_v56 }
 0x1b3   :  { %v397_v22 = vsel %vm385_vm12, %v837_v13, 0.0  ;;  %v871_v23 = vrot.slane %v831_v10, %v371_v57  ;;  %vm446_vm11 = vcmp.eq.s32.totalorder %v811_v0, 6  ;;  %v882_v27 = vrot.slane %v831_v10, %v391_v59 }
 0x1b4   :  { %v381_v18 = vadd.f32 %v377_v16, %v361_v15  ;;  %v338_v25 = vsel %vm326_vm1, %v336_v20, 0.0  ;;  %v358_v26 = vsel %vm346_vm2, %v356_v21, 0.0  ;;  %v417_v29 = vsel %vm405_vm13, %v857_v17, 0.0 }
 0x1b5   :  { %v362_v32 = vadd.f32 %v358_v26, %v338_v25  ;;  %vm466_vm12 = vcmp.eq.s32.totalorder %v811_v0, 7  ;;  %vm427_vm1 = vcmp.eq.s32.totalorder %v823_v8, 5  ;;  %vm388_vm2 = vcmp.eq.s32.totalorder %v844_v14, 3  ;;  %v316_v26 = vpop.f32.mrf.mxu1 }
 0x1b6   :  { %v401_v24 = vadd.f32 %v397_v22, %v381_v18  ;;  %v437_v34 = vsel %vm425_vm14, %v863_v19, 0.0  ;;  %v378_v35 = vsel %vm366_vm3, %v871_v23, 0.0  ;;  %v907_v36 = vrot.slane %v831_v10, %v411_v9  ;;  %v298_v9 = vpop.f32.mrf.mxu0 }
 0x1b7   :  { %v382_v37 = vadd.f32 %v378_v35, %v362_v32  ;;  %v912_v38 = vrot.slane %v831_v10, %v431_v60  ;;  %v339_v39 = vsel %vm327_vm6, %v332_v1, 0.0  ;;  %v359_v40 = vsel %vm347_vm8, %v352_v2, 0.0 }
 0x1b8   :  { %v421_v33 = vadd.f32 %v417_v29, %v401_v24  ;;  %vm447_vm13 = vcmp.eq.s32.totalorder %v823_v8, 6  ;;  %vm408_vm14 = vcmp.eq.s32.totalorder %v844_v14, 4  ;;  %v517_v41 = vmul.f32 %v310_v28, %v310_v28  ;;  %v300_v22 = vpop.f32.mrf.mxu0 }
 0x1b9   :  { %v398_v44 = vsel %vm386_vm4, %v882_v27, 0.0  ;;  %v457_v47 = vsel %vm445_vm15, %v889_v30, 0.0  ;;  %vm1046_vm6 = vcmp.eq.s32.totalorder %v796_v58, 7  ;;  %v363_v50 = vadd.f32 %v359_v40, %v339_v39 }
 0x1ba   :  { %v441_v42 = vadd.f32 %v437_v34, %v421_v33  ;;  %v477_v48 = vsel %vm1046_vm6, %v893_v31, 0.0  ;;  %v402_v49 = vadd.f32 %v398_v44, %v382_v37  ;;  %vm1047_vm4 = vcmp.eq.s32.totalorder %v811_v0, 4 }
 0x1bb   :  { %v418_v51 = vsel %vm1047_vm4, %v907_v36, 0.0  ;;  %v456_v52 = vrot.slane %v831_v10, %v451_v61  ;;  %v379_v53 = vsel %vm367_vm9, %v813_v3, 0.0  ;;  %vm1048_vm15 = vcmp.eq.s32.totalorder %v811_v0, 5 }
 0x1bc   :  { %v461_v5 = vadd.f32 %v457_v47, %v441_v42  ;;  %v422_v54 = vadd.f32 %v418_v51, %v402_v49  ;;  %v438_v55 = vsel %vm1048_vm15, %v912_v38, 0.0  ;;  %v955_v56 = vrot.slane %v831_v10, %v471_v62 }
 0x1bd   :  { %v383_v57 = vadd.f32 %v379_v53, %v363_v50  ;;  %vm1049_vm4 = vcmp.eq.s32.totalorder %v796_v58, %v818_v7  ;;  %vm508_vm9 = vcmp.eq.s32.totalorder %v928_v45, 1  ;;  %vm495_vm15 = vcmp.eq.s32.totalorder %v823_v8, %v930_v46 }
 0x1be   :  { %vm963_vm3 = vmand %vm1049_vm4, %vm507_vm10  ;;  %v481_v60 = vadd.f32 %v477_v48, %v461_v5  ;;  %vm1052_vm6 = vcmp.eq.s32.totalorder %v823_v8, 3  ;;  %vm1053_vm8 = vcmp.eq.s32.totalorder %v844_v14, 0  ;;  %v360_v58 = vsel %vm348_vm5, %v356_v21, 0.0 }
 0x1bf   :  { %v399_v61 = vsel %vm1052_vm6, %v837_v13, 0.0  ;;  %v340_v62 = vsel %vm1053_vm8, %v336_v20, 0.0  ;;  %v521_v63 = vsel %vm963_vm3, %v517_v41, 0.0  ;;  %v442_v1 = vadd.f32 %v438_v55, %v422_v54  ;;  %v304_v41 = vpop.f32.mrf.mxu0 }
 0x1c0   :  { %v403_v2 = vadd.f32 %v399_v61, %v383_v57  ;;  %v364_v3 = vadd.f32 %v360_v58, %v340_v62  ;;  %v513_v10 = vmul.f32 %v481_v60, %v298_v9  ;;  %v458_v11 = vsel %vm446_vm11, %v456_v52, 0.0 }
 0x1c1   :  { %v419_v12 = vsel %vm407_vm7, %v857_v17, 0.0  ;;  %v380_v13 = vsel %vm368_vm0, %v871_v23, 0.0  ;;  %v518_v15 = vmul.f32 %v312_v6, %v312_v6  ;;  %v462_v16 = vadd.f32 %v458_v11, %v442_v1  ;;  %v306_v5 = vpop.f32.mrf.mxu0 }
 0x1c2   :  { %v423_v18 = vadd.f32 %v419_v12, %v403_v2  ;;  %v384_v20 = vadd.f32 %v380_v13, %v364_v3  ;;  %v525_v21 = vadd.f32 %v521_v63, %v513_v10  ;;  %v478_v24 = vsel %vm466_vm12, %v955_v56, 0.0 }
 0x1c3   :  { %v439_v25 = vsel %vm427_vm1, %v863_v19, 0.0  ;;  %v400_v17 = vsel %vm388_vm2, %v882_v27, 0.0  ;;  %vm541_vm0 = vcmp.ne.s32.totalorder %v923_v43, 2  ;;  %v482_v23 = vadd.f32 %v478_v24, %v462_v16 }
 0x1c4   :  { %v443_v28 = vadd.f32 %v439_v25, %v423_v18  ;;  %v404_v29 = vadd.f32 %v400_v17, %v384_v20  ;;  %v529_v32 = vmul.f32 0.125, %v525_v21  ;;  %v537_v33 = vadd.s32 128, %v923_v43 }
 0x1c5   :  { %v459_v34 = vsel %vm447_vm13, %v889_v30, 0.0  ;;  %v420_v19 = vsel %vm408_vm14, %v907_v36, 0.0  ;;  %vm1054_vm5 = vcmp.eq.s32.totalorder %v811_v0, %v818_v7  ;;  %v514_v27 = vmul.f32 %v482_v23, %v300_v22  ;;  %v318_v36 = vpop.f32.mrf.mxu1  ;;  %vm511_vm14 = vmand %vm495_vm15, %vm508_vm9 }
 0x1c6   :  { %vm510_vm7 = vmand %vm1054_vm5, %vm507_vm10  ;;  %v463_v35 = vadd.f32 %v459_v34, %v443_v28  ;;  %v424_v37 = vadd.f32 %v420_v19, %v404_v29  ;;  %vm468_vm11 = vcmp.eq.s32.totalorder %v844_v14, 7  ;;  %v519_v40 = vmul.f32 %v316_v26, %v316_v26 }
 0x1c7   :  { %v522_v39 = vsel %vm510_vm7, %v518_v15, 0.0  ;;  %vm1055_vm12 = vcmp.eq.s32.totalorder %v823_v8, 7  ;;  %vm1056_vm1 = vcmp.eq.s32.totalorder %v844_v14, 5  ;;  %v555_v0 = vsel %vm541_vm0, %v529_v32, 1.0 }
 0x1c8   :  { %v479_v30 = vsel %vm1055_vm12, %v893_v31, 0.0  ;;  %v440_v4 = vsel %vm1056_vm1, %v912_v38, 0.0  ;;  %v526_v7 = vadd.f32 %v522_v39, %v514_v27  ;;  %vm544_vm10 = vcmp.lt.s32.totalorder %v537_v33, 200 }
 0x1c9   :  { %v483_v42 = vadd.f32 %v479_v30, %v463_v35  ;;  %v444_v44 = vadd.f32 %v440_v4, %v424_v37  ;;  %vm1057_vm2 = vcmp.eq.s32.totalorder %v844_v14, 6  ;;  %vm496_vm13 = vcmp.eq.s32.totalorder %v844_v14, %v930_v46 }
 0x1ca   :  { %v460_v47 = vsel %vm1057_vm2, %v456_v52, 0.0  ;;  %v530_v31 = vmul.f32 0.125, %v526_v7  ;;  %v523_v49 = vsel %vm511_vm14, %v519_v40, 0.0  ;;  %v520_v50 = vmul.f32 %v318_v36, %v318_v36  ;;  %vm512_vm3 = vmand %vm496_vm13, %vm508_vm9 }
 0x1cb   :  { %v515_v38 = vmul.f32 %v483_v42, %v304_v41  ;;  %v464_v48 = vadd.f32 %v460_v47, %v444_v44  ;;  %667 = vlog2.f32 %v555_v0  ;;  %v480_v51 = vsel %vm468_vm11, %v955_v56, 0.0 }
 0x1cc   :  { %v556_v52 = vsel %vm544_vm10, %v530_v31, 1.0  ;;  %v524_v55 = vsel %vm512_vm3, %v520_v50, 0.0  ;;  %vm595_vm8 = vcmask 0  }
 0x1cd   :  { %v527_v53 = vadd.f32 %v523_v49, %v515_v38  ;;  %v484_v54 = vadd.f32 %v480_v51, %v464_v48  ;;  %669 = vlog2.f32 %v556_v52 }
 0x1cf   :  { %v531_v8 = vmul.f32 0.125, %v527_v53  ;;  %v516_v46 = vmul.f32 %v484_v54, %v306_v5 }
 0x1d1   :  { %v557_v57 = vsel %vm541_vm0, %v531_v8, 1.0  ;;  %v528_v59 = vadd.f32 %v524_v55, %v516_v46 }
 0x1d2   :  { %671 = vlog2.f32 %v557_v57 }
 0x1d3   :  { %v532_v6 = vmul.f32 0.125, %v528_v59 }
 0x1d5   :  { %v558_v14 = vsel %vm544_vm10, %v532_v6, 1.0 }
 0x1d6   :  { %673 = vlog2.f32 %v558_v14 }
 0x1d8   :  { %v668_v56 = vpop.eup %667 }
 0x1d9   :  { %v560_v60 = vmul.f32 0.6931472, %v668_v56 }
 0x1da   :  { %v670_v9 = vpop.eup %669 }
 0x1db   :  { %v562_v61 = vmul.f32 0.6931472, %v670_v9 }
 0x1dd   :  { %v582_v62 = vadd.f32 %v562_v61, %v560_v60 }
 0x1df   :  { %v672_v58 = vpop.eup %671 }
 0x1e0   :  { %v564_v45 = vmul.f32 0.6931472, %v672_v58 }
 0x1e2   :  { %v583_v63 = vadd.f32 %v582_v62, %v564_v45 }
 0x1e3   :  { %v674_v1 = vpop.eup %673 }
 0x1e4   :  { %v566_v2 = vmul.f32 0.6931472, %v674_v1 }
 0x1e6   :  { %v584_v3 = vadd.f32 %v583_v63, %v566_v2 }
 0x1e8   :  { %585 = vadd.xlane.f32.xlu0 %v584_v3 }
 0x271   :  { %v586_v43 = vpop.xlane.xlu0 %585 }
 0x272   :  { %v587_v10 = vrot.slane %v586_v43, 4 }
 0x274   :  { %v588_v11 = vadd.f32 %v587_v10, %v586_v43 }
 0x276   :  { %v589_v12 = vrot.slane %v588_v11, 2 }
 0x278   :  { %v590_v13 = vadd.f32 %v589_v12, %v588_v11 }
 0x27a   :  { %v591_v15 = vrot.slane %v590_v13, 1 }
 0x27c   :  { %v592_v16 = vadd.f32 %v591_v15, %v590_v13 }
 0x27e   :  { %636 = vpush %v592_v16 }
 0x2af   :  { %s637_s27 = spop %636 }
 0x2b0   :  { %v594_v18 = vstv %s637_s27 }
 0x2b1   :  { %596 = vst.msk [vmem:[#allocation3] sm:$0x1] %vm595_vm8, %v594_v18 }
 0x2b2   :  { %686 = shalt.err (!%p683_p4)
}
 0x2b3   :  { %606 = dma.vmem_to_hbm [thread:$0]  %s604_s26, 16, %s1045_s6, [#allocation4]  }
 0x2b4   :  { %695 = dma.done.wait [#allocation4], 16  }
 0x2b5   :  { %696 = vsyncadd [#allocation4], 4294967280 }
 0x2b6   :  { %610 = vsyncpa [#allocation4], 1 }

</bundles_post_ra>
